<compile_context>
chip_gen: v6e
topology: v6e:2x2x1
jax: 0.10.0
libtpu: 0.0.40
codegen_flags: <defaults>
</compile_context>

<pallas_src>
import functools
import math

import jax
import jax.numpy as jnp
from jax.experimental import pallas as pl
from jax.experimental.pallas import tpu as pltpu


_VMEM_LIMIT = 32 * 1024 * 1024  # safe on v5e/v6e (128 MiB) and v7x (64 MiB)


def _round_up(x, m):
    return ((x + m - 1) // m) * m


def _cdiv(a, b):
    return -(-a // b)


def _pick_tm(rows, max_tm=512):
    """M tile: >=2 tiles when possible (v7x megacore), low padding waste."""
    rows8 = _round_up(max(rows, 8), 8)
    n_tiles = max(2, _cdiv(rows8, max_tm))      # aim for at least 2 M tiles
    n_tiles = min(n_tiles, rows8 // 8)          # but tiles of at least 8 rows
    n_tiles = max(n_tiles, 1)
    tm = _round_up(_cdiv(rows8, n_tiles), 8)
    return min(tm, max_tm)


# ----------------------------- Pallas kernel --------------------------------

def _matmul_kernel(p_ref, w_ref, *rest, mode, bn_stats, multi_k):
    """Tiled out = act(patches @ w); grid = (M, N, K) with K innermost.

    bn_stats: also emit per-channel [sum; sum_sq] for this M tile (f32, taken
    from the accumulator before the output downcast).
    multi_k:  K grid has >1 step -> use a f32 VMEM accumulator; otherwise the
    dot result is used directly (no scratch round-trip).
    """
    st_ref = None
    acc_ref = None
    if bn_stats and multi_k:
        o_ref, st_ref, acc_ref = rest
    elif bn_stats:
        o_ref, st_ref = rest
    elif multi_k:
        o_ref, acc_ref = rest
    else:
        (o_ref,) = rest

    def finalize(y):
        if bn_stats:
            s = jnp.sum(y, axis=0, keepdims=True)
            q = jnp.sum(y * y, axis=0, keepdims=True)
            pad = jnp.zeros((6, y.shape[1]), jnp.float32)
            st_ref[...] = jnp.concatenate([s, q, pad], axis=0)
        if mode == "lrelu":
            y = jnp.where(y > 0, y, 0.2 * y)
        elif mode == "sigmoid":
            y = jax.nn.sigmoid(y)
        o_ref[...] = y.astype(o_ref.dtype)

    if multi_k:
        @pl.when(pl.program_id(2) == 0)
        def _init():
            acc_ref[...] = jnp.zeros_like(acc_ref)

        acc_ref[...] += jnp.dot(p_ref[...], w_ref[...],
                                preferred_element_type=jnp.float32)

        @pl.when(pl.program_id(2) == pl.num_programs(2) - 1)
        def _fin():
            finalize(acc_ref[...])
    else:
        finalize(jnp.dot(p_ref[...], w_ref[...],
                         preferred_element_type=jnp.float32))


# ------------------------------ pallas_call wrapper -------------------------

def _tiled_conv_matmul(p_pad, w_pad, tm, tk, tn, mode, bn_stats, out_dtype):
    """p_pad (rows_p, k_p) bf16 x w_pad (k_p, cout_p) bf16 -> out_dtype."""
    rows_p, k_p = p_pad.shape
    cout_p = w_pad.shape[1]
    m_tiles = rows_p // tm
    n_tiles = cout_p // tn
    k_tiles = k_p // tk
    multi_k = k_tiles > 1

    out_shape = [jax.ShapeDtypeStruct((rows_p, cout_p), out_dtype)]
    out_specs = [pl.BlockSpec((tm, tn), lambda i, j, k: (i, j))]
    if bn_stats:
        out_shape.append(
            jax.ShapeDtypeStruct((8 * m_tiles, cout_p), jnp.float32))
        out_specs.append(pl.BlockSpec((8, tn), lambda i, j, k: (i, j)))
    scratch = [pltpu.VMEM((tm, tn), jnp.float32)] if multi_k else []

    out_bytes = rows_p * cout_p * jnp.dtype(out_dtype).itemsize
    stats_bytes = 8 * m_tiles * cout_p * 4 if bn_stats else 0
    cost = pl.CostEstimate(
        flops=2 * rows_p * k_p * cout_p,
        transcendentals=rows_p * cout_p if mode == "sigmoid" else 0,
        bytes_accessed=(rows_p * k_p * 2 + k_p * cout_p * 2
                        + out_bytes + stats_bytes))

    return pl.pallas_call(
        functools.partial(_matmul_kernel, mode=mode, bn_stats=bn_stats,
                          multi_k=multi_k),
        out_shape=tuple(out_shape),
        grid_spec=pltpu.PrefetchScalarGridSpec(
            num_scalar_prefetch=0,
            grid=(m_tiles, n_tiles, k_tiles),
            in_specs=[pl.BlockSpec((tm, tk), lambda i, j, k: (i, k)),
                      pl.BlockSpec((tk, tn), lambda i, j, k: (k, j))],
            out_specs=tuple(out_specs),
            scratch_shapes=scratch),
        compiler_params=pltpu.CompilerParams(
            dimension_semantics=("parallel", "parallel", "arbitrary"),
            vmem_limit_bytes=_VMEM_LIMIT),
        cost_estimate=cost,
    )(p_pad, w_pad)


# ------------------------------ JAX glue ------------------------------------

def _im2col(x_nhwc, k, stride, padding):
    """Extract kxk patches -> (N*Ho*Wo, k*k*Cin), ordered (kh, kw, Cin)."""
    n, h, w, c = x_nhwc.shape
    xp = jnp.pad(x_nhwc, ((0, 0), (padding, padding), (padding, padding), (0, 0)))
    ho = (h + 2 * padding - k) // stride + 1
    wo = (w + 2 * padding - k) // stride + 1
    pieces = []
    for di in range(k):
        for dj in range(k):
            pieces.append(
                xp[:, di:di + stride * ho:stride, dj:dj + stride * wo:stride, :])
    p = jnp.stack(pieces, axis=3)                        # (N, Ho, Wo, k*k, Cin)
    return p.reshape(n * ho * wo, k * k * c), ho, wo


def conv_layer_pallas(x_nhwc, w_oihw, stride, padding, mode,
                      gamma=None, beta=None, out_dtype=jnp.bfloat16):
    n, _, _, cin = x_nhwc.shape
    cout, _, kh, kw = w_oihw.shape
    # Patches are generated directly in bf16 (MXU operand dtype).
    patches, ho, wo = _im2col(x_nhwc.astype(jnp.bfloat16), kh, stride, padding)
    rows, k = patches.shape
    # (Cout, Cin, kh, kw) -> (kh, kw, Cin, Cout) -> (kh*kw*Cin, Cout)
    wmat = jnp.transpose(w_oihw, (2, 3, 1, 0)).reshape(kh * kw * cin, cout)
    wmat = wmat.astype(jnp.bfloat16)

    tm = _pick_tm(rows)
    tk = min(256, _round_up(k, 128))
    tn = min(256, _round_up(cout, 128))
    rows_p = _round_up(rows, tm)
    k_p = _round_up(k, tk)
    cout_p = _round_up(cout, tn)

    p_pad = jnp.pad(patches, ((0, rows_p - rows), (0, k_p - k)))
    w_pad = jnp.pad(wmat, ((0, k_p - k), (0, cout_p - cout)))

    bn_stats = (mode == "bn_lrelu")
    mm_mode = "none" if bn_stats else mode
    result = _tiled_conv_matmul(p_pad, w_pad, tm, tk, tn, mm_mode, bn_stats,
                                out_dtype)
    y = result[0][:rows, :cout].reshape(n, ho, wo, cout)

    if not bn_stats:
        return y

    # BatchNorm batch statistics (PyTorch training-mode BatchNorm2d, biased
    # variance, eps=1e-5) from the in-kernel f32 partial sums.  Padded rows
    # are exact zeros and contribute nothing to either sum.
    m_tiles = rows_p // tm
    st = result[1].reshape(m_tiles, 8, cout_p)
    ch_sum = jnp.sum(st[:, 0, :cout], axis=0)
    ch_sq = jnp.sum(st[:, 1, :cout], axis=0)
    mean = ch_sum / rows
    var = jnp.maximum(ch_sq / rows - mean * mean, 0.0)
    scale = gamma * jax.lax.rsqrt(var + 1e-5)
    shift = beta - mean * scale
    # The affine + LeakyReLU is applied lazily (fused into the next layer's
    # im2col) -- no dedicated elementwise pallas_call / HBM round trip.
    return y, (scale.reshape(1, 1, 1, cout), shift.reshape(1, 1, 1, cout))


def init_params(key, image_dim, hidden_dim, resolution):
    """Deterministic parameter init mirroring Discriminator.__init__ shapes."""
    n_layers = int(math.log2(resolution)) - 1
    params = []
    for i in range(n_layers):
        coeff_input = 2 ** (i - 1)
        coeff_output = 2 ** i
        if i == 0:
            coeff_input = image_dim / hidden_dim
        elif i == n_layers - 1:
            coeff_output = 1 / hidden_dim
        in_dim = int(hidden_dim * coeff_input)
        out_dim = int(hidden_dim * coeff_output)
        key, sub = jax.random.split(key)
        p = {"w": jax.random.normal(sub, (out_dim, in_dim, 4, 4), jnp.float32) * 0.05}
        if 0 < i < n_layers - 1:
            p["gamma"] = jnp.ones((out_dim,), jnp.float32)   # BN default init
            p["beta"] = jnp.zeros((out_dim,), jnp.float32)
        params.append(p)
    return params


def discriminator_forward(x_nchw, params):
    """Forward pass of Discriminator(image_dim, hidden_dim, resolution, is_wgan=False)."""
    x = jnp.transpose(x_nchw, (0, 2, 3, 1)).astype(jnp.bfloat16)  # NCHW->NHWC bf16
    pending = None  # deferred (scale, shift): BN affine + LeakyReLU of prev layer
    n_layers = len(params)
    for i, p in enumerate(params):
        if pending is not None:
            scale, shift = pending
            xf = x.astype(jnp.float32) * scale + shift
            xf = jnp.where(xf > 0, xf, 0.2 * xf)
            x = xf.astype(jnp.bfloat16)
            pending = None
        if i == 0:                                        # conv + LeakyReLU(0.2)
            x = conv_layer_pallas(x, p["w"], 2, 1, "lrelu")
        elif i == n_layers - 1:                           # conv + Sigmoid
            x = conv_layer_pallas(x, p["w"], 1, 0, "sigmoid",
                                  out_dtype=jnp.float32)
        else:                                             # conv + BN + LeakyReLU
            x, pending = conv_layer_pallas(x, p["w"], 2, 1, "bn_lrelu",
                                           p["gamma"], p["beta"])
    return jnp.transpose(x, (0, 3, 1, 2)).astype(jnp.float32)     # (N,1,1,1)


# Pure-JAX (full f32) reference for correctness checking.
def reference_forward(x_nchw, params):
    x = x_nchw
    n_layers = len(params)
    for i, p in enumerate(params):
        stride, pad = (2, 1) if i < n_layers - 1 else (1, 0)
        y = jax.lax.conv_general_dilated(
            x, p["w"], (stride, stride), [(pad, pad), (pad, pad)],
            dimension_numbers=("NCHW", "OIHW", "NCHW"))
        if i == 0:
            y = jnp.where(y > 0, y, 0.2 * y)
        elif i == n_layers - 1:
            y = jax.nn.sigmoid(y)
        else:
            mean = jnp.mean(y, axis=(0, 2, 3), keepdims=True)
            var = jnp.mean((y - mean) ** 2, axis=(0, 2, 3), keepdims=True)
            y = (y - mean) * jax.lax.rsqrt(var + 1e-5)
            y = y * p["gamma"].reshape(1, -1, 1, 1) + p["beta"].reshape(1, -1, 1, 1)
            y = jnp.where(y > 0, y, 0.2 * y)
        x = y
    return x


if __name__ == "__main__":
    batch, image_dim, hidden_dim, resolution = 2, 4, 16, 16
    key = jax.random.PRNGKey(0)
    k_x, k_p = jax.random.split(key)
    x = jax.random.normal(k_x, (batch, image_dim, resolution, resolution), jnp.float32)
    params = init_params(k_p, image_dim, hidden_dim, resolution)

    out = jax.block_until_ready(discriminator_forward(x, params))
    ref = jax.block_until_ready(reference_forward(x, params))

    assert out.shape == (batch, 1, 1, 1), out.shape
    # Kernel uses bf16 MXU operands and bf16 intermediate activations (f32
    # accumulation / stats); reference is full f32, so tolerance is relaxed.
    assert jnp.allclose(out, ref, atol=1e-2, rtol=1e-2), (
        float(jnp.max(jnp.abs(out - ref))))
    print("KERNEL_OK")
</pallas_src>

<mosaic_0001>
module attributes {stable_mosaic.version = 11 : i64} {
  func.func @_matmul_kernel(%arg0: i32, %arg1: i32, %arg2: i32, %arg3: memref<64x128xbf16, #tpu.memory_space<vmem>>, %arg4: memref<128x128xbf16, #tpu.memory_space<vmem>>, %arg5: memref<64x128xbf16, #tpu.memory_space<vmem>>) attributes {dimension_semantics = [#tpu.dimension_semantics<parallel>, #tpu.dimension_semantics<parallel>, #tpu.dimension_semantics<arbitrary>], iteration_bounds = array<i64: 2, 1, 1>, scalar_prefetch = 0 : i64, scratch_operands = 0 : i64, tpu.core_type = #tpu.core_type<tc>, window_params = [{transform_indices = @transform_0, window_bounds = array<i64: 64, 128>}, {transform_indices = @transform_1, window_bounds = array<i64: 128, 128>}, {transform_indices = @transform_2, window_bounds = array<i64: 64, 128>}]} {
    %c0 = arith.constant 0 : index
    %c0_0 = arith.constant 0 : index
    %0 = vector.load %arg3[%c0, %c0_0] : memref<64x128xbf16, #tpu.memory_space<vmem>>, vector<64x128xbf16>
    %c0_1 = arith.constant 0 : index
    %c0_2 = arith.constant 0 : index
    %1 = vector.load %arg4[%c0_1, %c0_2] : memref<128x128xbf16, #tpu.memory_space<vmem>>, vector<128x128xbf16>
    %cst = arith.constant dense<0.000000e+00> : vector<64x128xf32>
    %2 = tpu.matmul %0, %1, %cst {dimension_numbers = #tpu.dot_dimension_numbers<[1], [0], [0], [1], [0, 0, 1, 1], [], []>} : vector<64x128xbf16>, vector<128x128xbf16>, vector<64x128xf32> -> vector<64x128xf32>
    %cst_3 = arith.constant 0.000000e+00 : f32
    %3 = vector.broadcast %cst_3 : f32 to vector<64x128xf32>
    %4 = arith.cmpf ogt, %2, %3 : vector<64x128xf32>
    %cst_4 = arith.constant 2.000000e-01 : f32
    %5 = vector.broadcast %cst_4 : f32 to vector<64x128xf32>
    %6 = arith.mulf %5, %2 : vector<64x128xf32>
    %7 = arith.select %4, %2, %6 : vector<64x128xi1>, vector<64x128xf32>
    %8 = arith.truncf %7 : vector<64x128xf32> to vector<64x128xbf16>
    %c0_5 = arith.constant 0 : index
    %c0_6 = arith.constant 0 : index
    %9 = vector.load %arg5[%c0_5, %c0_6] : memref<64x128xbf16, #tpu.memory_space<vmem>>, vector<64x128xbf16>
    tpu.vector_store %arg5[%c0_5, %c0_6], %8 {strides = array<i32>} : memref<64x128xbf16, #tpu.memory_space<vmem>>, vector<64x128xbf16>,
    return
  }
  func.func @transform_0(%arg0: i32, %arg1: i32, %arg2: i32) -> (i32, i32) {
    %c0_i32 = arith.constant 0 : i32
    return %arg0, %arg2 : i32, i32
  }
  func.func @transform_1(%arg0: i32, %arg1: i32, %arg2: i32) -> (i32, i32) {
    %c0_i32 = arith.constant 0 : i32
    return %arg2, %arg1 : i32, i32
  }
  func.func @transform_2(%arg0: i32, %arg1: i32, %arg2: i32) -> (i32, i32) {
    %c0_i32 = arith.constant 0 : i32
    return %arg0, %arg1 : i32, i32
  }
}

</mosaic_0001>

<bundles_post_ra>
// kernel: tpu_custom_call.1
= control target key start
LH: loop header
LB: loop body
LE: loop exit
PB: predicated region body
PF: predicated region fallthrough
CT: control target
= control target key end

     0   :  { %7 = vsyncpa [#allocation3], 0  ;;  %s1137_s0 = inlined_call_operand.hbm [shape: bf16[128,128], index: 0, kind: input, shape index: {}]   ;;  %s1138_s1 = inlined_call_operand.hbm [shape: bf16[128,128], index: 1, kind: input, shape index: {}]   ;;  %s1139_s2 = inlined_call_operand.hbm [shape: bf16[128,128], index: 2, kind: output, shape index: {}]  }
   0x1   :  { %9 = vsyncpa [#allocation3 + $0x1], 0 }
   0x2   :  { %10 = vsyncpa [#allocation6], 0 }
   0x3   :  { %11 = vsyncpa [#allocation4], 0 }
   0x4   :  { %13 = vsyncpa [#allocation4 + $0x1], 0  ;;  %s931_s9 = smov 0   ;;  %s933_s10 = smov 0  }
   0x5   :  { %s935_s11 = smov 0   ;;  %s937_s12 = smov 0  }
   0x6   :  { %s939_s13 = smov 0   ;;  %s941_s14 = smov 0  }
   0x7 LB: > { %s558_s15 = sadd.s32 4294967295, %s907_s14   ;;  %s559_s16 = sadd.s32 4294967294, %s907_s14   ;;  %s907_s14 = sphi %s941_s14, %s19_s14   ;;  %s903_s13 = sphi %s939_s13, %s1159_s13   ;;  %s899_s12 = sphi %s937_s12, %s1158_s12   ;;  %s895_s11 = sphi %s935_s11, %s1157_s11   ;;  %s891_s10 = sphi %s933_s10, %s1156_s10   ;;  %s887_s9 = sphi %s931_s9, %s1155_s9  }
   0x8   : > { %p60_p0 = scmp.ne.s32.totalorder %s891_s10, %s887_s9  ;;  %p965_p1 = scmp.eq.s32.totalorder %s558_s15, 0 }
   0x9   : > { %p969_p2 = scmp.eq.s32.totalorder %s558_s15, 1  ;;  %p120_p3 = scmp.eq.s32.totalorder %s559_s16, 1 }
   0xa   : > { %p975_p4 = por %p965_p1, %p60_p0  ;;  %p560_p5 = scmp.ge.s32.totalorder %s907_s14, 1 }
   0xb   : > { %p980_p6 = por %p120_p3, %p60_p0  ;;  %p127_p7 = scmp.lt.s32.totalorder %s907_s14, 3 }
   0xc   : > { %s1144_s19 = scalar_select %p975_p4, 1, 0 }
   0xd   : > { %s1145_s20 = scalar_select %p980_p6, 1, 0 }
   0xe   : > { %p985_p8 = pnand %p560_p5, %p127_p7  ;;  %s909_s22 = smov [#allocation5]  }
   0xf   : > { %s143_s23 = sshll.u32 %s909_s22, 4  ;;  %s38_s25 = sadd.s32 1, %s903_s13  ;;  %s144_s23 = int_to_ptr.vmem [resolvable:$true] %s143_s23 }
  0x10   : > { %p688_p9 = pneg %p985_p8  ;;  %s780_s26 = scalar_lea.vmem %s144_s23, 1024 }
  0x11   : > { %p781_p13 = scmp.ne.s32.totalorder %s144_s23, %s780_s26  ;;  %p788_p5 = scmp.lt.s32.totalorder %s144_s23, %s144_s23 }
  0x12   : > { %p994_p11 = pnand %p688_p9, %p965_p1  ;;  %p789_p7 = scmp.lt.s32.totalorder %s780_s26, %s780_s26 }
  0x14   : > { %p771_p12 = pneg %p994_p11  ;;  %p790_p6 = por %p789_p7, %p788_p5 }
  0x16   : > { %p783_p0 = pnand %p781_p13, %p771_p12 }
  0x18   : > { %p784_p3 = pneg %p783_p0 }
  0x1a   : > { %p791_p4 = pnand %p790_p6, %p784_p3 }
  0x1c   : > { %794 = shalt.err (!%p791_p4)
}
  0x1d   : > { %s1141_s27 = smov 64   ;;  %s911_s28 = smov 4  }
  0x1e   : > { %691 = dma.hbm_to_vmem [thread:$0]  (!%p994_p11), %s1138_s1, 1024, %s144_s23, [#allocation6], %s1141_s27, %s1141_s27, %s911_s28  }
  0x1f   : > { %p40_p4 = scmp.ge.s32.totalorder %s38_s25, 2  ;;  %s47_s3 = sadd.s32 1, %s895_s11 }
  0x20   : > { %p54_p6 = scmp.ne.s32.totalorder %s895_s11, %s891_s10  ;;  %p55_p9 = scmp.eq.s32.totalorder %s907_s14, 0 }
  0x21   : > { %s1161_s25 = smov (%p40_p4, %s38_s25), 0  ;;  %p701_p0 = scmp.lt.s32.totalorder %s907_s14, 2 }
  0x22   : > { %p1015_p12 = por %p55_p9, %p54_p6  ;;  %p1021_p13 = por %p969_p2, %p54_p6 }
  0x23   : > { %s42_s6 = ssub.s32 %s903_s13, %s1161_s25  ;;  %s157_s7 = sand.u32 1, %s895_s11  }
  0x24   : > { %p45_p11 = scmp.eq.s32.totalorder %s42_s6, 0  ;;  %s563_s8 = sshll.u32 %s157_s7, 5 }
  0x25   : > { %s595_s16 = sshll.u32 %s903_s13, 9  ;;  %s161_s26 = scalar_lea.vmem [#allocation2], %s563_s8 }
  0x26   : > { %s1030_s15 = scalar_select %p45_p11, %s895_s11, %s47_s3  }
  0x27   : > { %s168_s24 = scalar_lea.hbm %s1137_s0, %s595_s16  ;;  %s169_s29 = sshll.u32 %s161_s26, 4  ;;  %s170_s29 = int_to_ptr.vmem [resolvable:$true] %s169_s29 }
  0x28   : > { %p1038_p2 = pnand %p701_p0, %p1015_p12  ;;  %s158_s30 = scalar_lea.sflag [#allocation3], %s157_s7 }
  0x29   : > { %s808_s6 = scalar_lea.vmem %s170_s29, 512  ;;  %s912_s3 = smov [#allocation2]  }
  0x2a   : > { %p797_p3 = pneg %p1038_p2  ;;  %p809_p5 = scmp.ne.s32.totalorder %s170_s29, %s808_s6 }
  0x2b   : > { %s813_s27 = sshll.u32 %s912_s3, 4  ;;  %s814_s27 = int_to_ptr.vmem [resolvable:$false] %s813_s27 }
  0x2c   : > { %p811_p7 = pnand %p809_p5, %p797_p3  ;;  %s815_s16 = scalar_lea.vmem %s814_s27, 1024 }
  0x2d   : > { %p816_p6 = scmp.lt.s32.totalorder %s170_s29, %s814_s27  ;;  %p817_p9 = scmp.lt.s32.totalorder %s815_s16, %s808_s6 }
  0x2e   : > { %p812_p4 = pneg %p811_p7 }
  0x2f   : > { %p818_p11 = por %p817_p9, %p816_p6 }
  0x31   : > { %p819_p10 = pnand %p818_p11, %p812_p4 }
  0x33   : > { %822 = shalt.err (!%p819_p10)
}
  0x34   : > { %s1151_s4 = smov 64   ;;  %181 = sbr.rel (%p985_p8) target bundleno = 312 (0x138), region = 28 }
  0x35   : > { %695 = dma.hbm_to_vmem [thread:$0]  (!%p1038_p2), %s168_s24, 512, %s170_s29, %s158_s30, %s1151_s4, %s1151_s4, %s911_s28  }
  0x36   : > { %s1052_s7 = sand.u32 (!%p985_p8), 1, %s891_s10   ;;  %p1152_p10 = scmp.ne.s32.totalorder (!%p985_p8), %s1144_s19, 0 }
  0x37   : > { %s567_s27 = sshll.u32 (!%p985_p8), %s1052_s7, 5  ;;  %s184_s8 = scalar_lea.sflag (!%p985_p8), [#allocation3], %s1052_s7 }
  0x38   : > { %s1058_s22 = scalar_lea.vmem (!%p985_p8), [#allocation2], %s567_s27 }
  0x39   : > { %874 = dma.done.wait (%p1152_p10), %s184_s8, 512  }
  0x3a   : > { %876 = vsyncadd (%p1152_p10), %s184_s8, 4294966784 }
  0x3b   : > { %878 = dma.done.wait (%p965_p1), [#allocation6], 1024  }
  0x3c   : > { %880 = vsyncadd (%p965_p1), [#allocation6], 4294966272  ;;  %v757_v0 = vld [vmem:[#allocation5 + $0x38] sm:$0xff]   ;;  %v758_v1 = vld [vmem:[#allocation5 + $0x30] sm:$0xff]   ;;  %s1074_s17 = scalar_lea.vmem [#allocation7], %s567_s27  ;;  %s604_s21 = sshll.u32 %s899_s12, 9 }
  0x3d   : > { %640 = vmatprep.subr.bf16.mxu0 %v757_v0  ;;  %664 = vmatprep.subr.bf16.mxu1 %v757_v0  ;;  %v759_v2 = vld [vmem:[#allocation5 + $0x28] sm:$0xff]   ;;  %v760_v3 = vld [vmem:[#allocation5 + $0x20] sm:$0xff]   ;;  %v766_v5 = vld [vmem:[%s1058_s22 + $0x10] sm:$0xff]   ;;  %s456_s19 = sshll.u32 %s1074_s17, 4  ;;  %s1086_s23 = scalar_lea.hbm %s1139_s2, %s604_s21  ;;  %s1079_s19 = int_to_ptr.vmem [resolvable:$true] %s456_s19 }
  0x3e   : > { %641 = vmatpush3.bf16.msra.mxu0 %v757_v0  ;;  %672 = vmatpush3.bf16.msra.mxu1 %v757_v0  ;;  %v765_v4 = vld [vmem:[%s1058_s22] sm:$0xff]   ;;  %v761_v6 = vld [vmem:[#allocation5 + $0x18] sm:$0xff]   ;;  %v762_v7 = vld [vmem:[#allocation5 + $0x10] sm:$0xff]   ;;  %s442_s24 = scalar_lea.sflag [#allocation4], %s1052_s7  ;;  %s823_s26 = scalar_lea.vmem %s1079_s19, 512 }
  0x3f   : > { %642 = vmatprep.subr.bf16.mxu0 %v758_v1  ;;  %665 = vmatprep.subr.bf16.mxu1 %v758_v1  ;;  %v763_v8 = vld [vmem:[#allocation5 + $0x8] sm:$0xff]   ;;  %v764_v9 = vld [vmem:[#allocation5] sm:$0xff]   ;;  %v768_v11 = vld [vmem:[%s1058_s22 + $0x18] sm:$0xff]   ;;  %p824_p1 = scmp.ne.s32.totalorder %s1079_s19, %s823_s26  ;;  %s913_s29 = smov [#allocation7]  }
  0x40   : > { %656 = vmatprep.mubr.bf16.mxu0 %v765_v4  ;;  %660 = vmatprep.mubr.bf16.mxu1 %v766_v5  ;;  %v767_v10 = vld [vmem:[%s1058_s22 + $0x8] sm:$0xff]   ;;  %s827_s18 = sshll.u32 %s913_s29, 4  ;;  %s828_s18 = int_to_ptr.vmem [resolvable:$false] %s827_s18 }
  0x41   : > { %p825_p8 = pnand %p824_p1, %p1021_p13  ;;  %s829_s30 = scalar_lea.vmem %s828_s18, 1024 }
  0x42   : > { %643 = vmatpush3.bf16.msra.mxu0 %v758_v1  ;;  %673 = vmatpush3.bf16.msra.mxu1 %v758_v1  ;;  %p830_p0 = scmp.lt.s32.totalorder %s1079_s19, %s828_s18  ;;  %p831_p2 = scmp.lt.s32.totalorder %s829_s30, %s823_s26 }
  0x43   : > { %644 = vmatprep.subr.bf16.mxu0 %v759_v2  ;;  %666 = vmatprep.subr.bf16.mxu1 %v759_v2  ;;  %p826_p12 = pneg %p825_p8 }
  0x44   : > { %p832_p3 = por %p831_p2, %p830_p0 }
  0x46   : > { %645 = vmatpush3.bf16.msra.mxu0 %v759_v2  ;;  %674 = vmatpush3.bf16.msra.mxu1 %v759_v2  ;;  %p833_p5 = pnand %p832_p3, %p826_p12 }
  0x47   : > { %646 = vmatprep.subr.bf16.mxu0 %v760_v3  ;;  %667 = vmatprep.subr.bf16.mxu1 %v760_v3 }
  0x4a   : > { %647 = vmatpush3.bf16.msra.mxu0 %v760_v3  ;;  %675 = vmatpush3.bf16.msra.mxu1 %v760_v3 }
  0x4b   : > { %648 = vmatprep.subr.bf16.mxu0 %v761_v6  ;;  %668 = vmatprep.subr.bf16.mxu1 %v761_v6 }
  0x4e   : > { %649 = vmatpush3.bf16.msra.mxu0 %v761_v6  ;;  %676 = vmatpush3.bf16.msra.mxu1 %v761_v6 }
  0x4f   : > { %650 = vmatprep.subr.bf16.mxu0 %v762_v7  ;;  %669 = vmatprep.subr.bf16.mxu1 %v762_v7 }
  0x52   : > { %651 = vmatpush3.bf16.msra.mxu0 %v762_v7  ;;  %677 = vmatpush3.bf16.msra.mxu1 %v762_v7 }
  0x53   : > { %652 = vmatprep.subr.bf16.mxu0 %v763_v8  ;;  %670 = vmatprep.subr.bf16.mxu1 %v763_v8 }
  0x56   : > { %653 = vmatpush3.bf16.msra.mxu0 %v763_v8  ;;  %678 = vmatpush3.bf16.msra.mxu1 %v763_v8 }
  0x57   : > { %654 = vmatprep.subr.bf16.mxu0 %v764_v9  ;;  %671 = vmatprep.subr.bf16.mxu1 %v764_v9 }
  0x5a   : > { %655 = vmatpush3.bf16.msra.mxu0 %v764_v9  ;;  %679 = vmatpush3.bf16.msra.mxu1 %v764_v9 }
  0x5d   : > { %657 = vmatmul.mubr.bf16.vlgmr.msra.gmra.mxu0 %v767_v10  ;;  %661 = vmatmul.mubr.bf16.vlgmr.msra.gmra.mxu1 %v768_v11 }
 0x11d   : > { %v658_v12 = vpop.f32.mrf.mxu0  ;;  %v662_v13 = vpop.f32.mrf.mxu1 }
 0x11e   : > { %vm379_vm0 = vcmp.gt.f32.partialorder %v658_v12, 0.0  ;;  %v387_v14 = vmul.f32 0.2, %v658_v12  ;;  %vm383_vm1 = vcmp.gt.f32.partialorder %v662_v13, 0.0  ;;  %v391_v18 = vmul.f32 0.2, %v662_v13 }
 0x11f   : > { %v346_v15 = vpop.f32.mrf.mxu0  ;;  %v362_v16 = vpop.f32.mrf.mxu1 }
 0x120   : > { %v395_v17 = vsel %vm379_vm0, %v658_v12, %v387_v14  ;;  %v385_v21 = vmul.f32 0.2, %v346_v15  ;;  %vm377_vm4 = vcmp.gt.f32.partialorder %v346_v15, 0.0  ;;  %vm381_vm5 = vcmp.gt.f32.partialorder %v362_v16, 0.0 }
 0x121   : > { %v659_v19 = vpop.f32.mrf.mxu0  ;;  %v663_v20 = vpop.f32.mrf.mxu1  ;;  %v389_v23 = vmul.f32 0.2, %v362_v16  ;;  %v399_v29 = vsel %vm383_vm1, %v662_v13, %v391_v18 }
 0x122   : > { %vm380_vm2 = vcmp.gt.f32.partialorder %v659_v19, 0.0  ;;  %v388_v22 = vmul.f32 0.2, %v659_v19  ;;  %vm384_vm3 = vcmp.gt.f32.partialorder %v663_v20, 0.0  ;;  %v392_v24 = vmul.f32 0.2, %v663_v20 }
 0x123   : > { %v349_v25 = vpop.f32.mrf.mxu0  ;;  %v365_v26 = vpop.f32.mrf.mxu1  ;;  %v393_v33 = vsel %vm377_vm4, %v346_v15, %v385_v21  ;;  %v397_v36 = vsel %vm381_vm5, %v362_v16, %v389_v23 }
 0x124   : > { %v396_v27 = vsel %vm380_vm2, %v659_v19, %v388_v22  ;;  %vm378_vm6 = vcmp.gt.f32.partialorder %v349_v25, 0.0  ;;  %v386_v28 = vmul.f32 0.2, %v349_v25  ;;  %vm382_vm7 = vcmp.gt.f32.partialorder %v365_v26, 0.0 }
 0x125   : > { %v613_v30 = vpack.c.bf16 %v396_v27, %v395_v17  ;;  %v400_v31 = vsel %vm384_vm3, %v663_v20, %v392_v24  ;;  %v390_v32 = vmul.f32 0.2, %v365_v26 }
 0x126   : > { %v623_v34 = vpack.c.bf16 %v400_v31, %v399_v29  ;;  %v394_v35 = vsel %vm378_vm6, %v349_v25, %v386_v28 }
 0x127   : > { %625 = vst [vmem:[%s1074_s17 + $0x8] sm:$0xff] %v613_v30   ;;  %v608_v37 = vpack.c.bf16 %v394_v35, %v393_v33  ;;  %v398_v38 = vsel %vm382_vm7, %v365_v26, %v390_v32 }
 0x128   : > { %627 = vst [vmem:[%s1074_s17 + $0x18] sm:$0xff] %v623_v34   ;;  %v618_v39 = vpack.c.bf16 %v398_v38, %v397_v36 }
 0x129   : > { %609 = vst [vmem:[%s1074_s17] sm:$0xff] %v608_v37  }
 0x12a   : > { %626 = vst [vmem:[%s1074_s17 + $0x10] sm:$0xff] %v618_v39  }
 0x12b   : > { %836 = shalt.err (!%p833_p5)
}
 0x12c   : > { %s837_s6 = scalar_lea.hbm %s1086_s23, 512  ;;  %s841_s4 = scalar_lea.hbm %s1139_s2, 1024 }
 0x12d   : > { %p838_p7 = scmp.ne.s32.totalorder %s1086_s23, %s837_s6  ;;  %p842_p9 = scmp.lt.s32.totalorder %s1086_s23, %s1139_s2 }
 0x12e   : > { %p843_p11 = scmp.lt.s32.totalorder %s841_s4, %s837_s6 }
 0x12f   : > { %p839_p4 = pnand %p838_p7, %p1021_p13 }
 0x130   : > { %p844_p10 = por %p843_p11, %p842_p9 }
 0x131   : > { %p840_p6 = pneg %p839_p4 }
 0x133   : > { %p845_p1 = pnand %p844_p10, %p840_p6 }
 0x135   : > { %848 = shalt.err (!%p845_p1)
}
 0x136   : > { %s914_s22 = smov 64   ;;  %s915_s17 = smov 4  }
 0x137   : > { %686 = dma.vmem_to_hbm [thread:$0]  (%p1021_p13), %s1079_s19, 512, %s1086_s23, %s442_s24, %s914_s22, %s914_s22, %s915_s17  }
 0x138 PF: > { %s471_s21 = sand.u32 1, %s887_s9   ;;  %p1153_p8 = scmp.ne.s32.totalorder %s1145_s20, 0 }
 0x139   : > { %p1154_p12 = scmp.ge.s32.totalorder %s907_s14, 2  ;;  %s472_s12 = scalar_lea.sflag [#allocation4], %s471_s21 }
 0x13b   : > { %p697_p0 = pnand %p1154_p12, %p1153_p8 }
 0x13d   : > { %p698_p2 = pneg %p697_p0 }
 0x13f   : > { %882 = dma.done.wait (%p698_p2), %s472_s12, 512  }
 0x140   : > { %884 = vsyncadd (%p698_p2), %s472_s12, 4294966784  ;;  %s19_s14 = sadd.s32 1, %s907_s14   ;;  %s1155_s9 = smov %s891_s10 }
 0x141   : > { %p16_p3 = scmp.ge.s32.totalorder %s19_s14, 4   ;;  %s1156_s10 = smov %s895_s11 }
 0x142   : > { %s1157_s11 = smov %s1030_s15  ;;  %s1158_s12 = smov %s903_s13 }
 0x143   : > { %s1159_s13 = smov %s1161_s25  ;;  %18 = sbr.rel (!%p16_p3) target bundleno = 7 (0x7), region = 78 }
 0x148   :  { %477 = vsyncpa [#allocation3], 1 }
 0x149   :  { %479 = vsyncpa [#allocation3 + $0x1], 1 }
 0x14a   :  { %480 = vsyncpa [#allocation6], 1 }
 0x14b   :  { %481 = vsyncpa [#allocation4], 1 }
 0x14c   :  { %483 = vsyncpa [#allocation4 + $0x1], 1 }

</bundles_post_ra>
